<compile_context>
chip_gen: v5e
topology: v5e:2x2
jax: 0.10.0
libtpu: 0.0.40
codegen_flags: <defaults>
</compile_context>

<pallas_src>
import jax
import jax.numpy as jnp
from jax import lax
from jax.experimental import pallas as pl
from jax.experimental.pallas import tpu as pltpu

_NUM_LANES = 128
_VMEM_LIMIT = 64 * 1024 * 1024


def _largest_divisor_tile(n, candidates):
    for c in candidates:
        if n % c == 0:
            return c
    return n


def _bcast_minor(x, n):
    """Broadcast a lane-replicated (rows, L) tile to (rows, n).

    Uses jnp.tile (sublane-friendly copies) when n is a multiple of L, a plain
    lane sub-slice when n < L, and a 1->n lane splat only as a last resort.
    """
    L = x.shape[-1]
    if n == L:
        return x
    if n % L == 0:
        return jnp.tile(x, (1, n // L))
    if n < L:
        return x[:, :n]
    return jnp.broadcast_to(x[:, :1], (x.shape[0], n))


# ----------------------------- kernel 1: Q/K/V projection -------------------

def _qkv_projection_kernel(x_ref, wq_ref, bq_ref, wk_ref, bk_ref, wv_ref, bv_ref,
                           q_ref, k_ref, v_ref):
    # x_ref:  (ts, D) rows of the flattened (B*S, D) input.
    # w*_ref: (D, D) pre-transposed (in, out) weights; b*_ref: (1, D) f32 biases.
    # The 1/sqrt(d_k) scale is already folded into Wq/bq wrapper-side.
    x = x_ref[...]

    def project(w_ref, b_ref, out_ref):
        y = lax.dot_general(x, w_ref[...], (((1,), (0,)), ((), ())),
                            preferred_element_type=jnp.float32)
        out_ref[...] = (y + b_ref[...]).astype(out_ref.dtype)

    project(wq_ref, bq_ref, q_ref)
    project(wk_ref, bk_ref, k_ref)
    project(wv_ref, bv_ref, v_ref)


def _qkv_projection(x2d, wq_t, bq, wk_t, bk, wv_t, bv):
    rows, D = x2d.shape
    ts = rows if rows <= 256 else _largest_divisor_tile(
        rows, (256, 128, 64, 32, 16, 8))
    grid = (rows // ts,)
    row_spec = lambda i: (i, 0)
    const_spec = lambda i: (0, 0)
    out_sds = jax.ShapeDtypeStruct((rows, D), x2d.dtype)

    return pl.pallas_call(
        _qkv_projection_kernel,
        out_shape=(out_sds, out_sds, out_sds),
        grid_spec=pltpu.PrefetchScalarGridSpec(
            num_scalar_prefetch=0,
            grid=grid,
            in_specs=[
                pl.BlockSpec((ts, D), row_spec),    # x rows
                pl.BlockSpec((D, D), const_spec),   # Wq^T (scale folded in)
                pl.BlockSpec((1, D), const_spec),   # bq   (scale folded in)
                pl.BlockSpec((D, D), const_spec),   # Wk^T
                pl.BlockSpec((1, D), const_spec),   # bk
                pl.BlockSpec((D, D), const_spec),   # Wv^T
                pl.BlockSpec((1, D), const_spec),   # bv
            ],
            out_specs=[pl.BlockSpec((ts, D), row_spec)] * 3,
        ),
        compiler_params=pltpu.CompilerParams(
            dimension_semantics=("parallel",),
            vmem_limit_bytes=_VMEM_LIMIT,
        ),
    )(x2d, wq_t, bq, wk_t, bk, wv_t, bv)


# ----------------------------- kernel 2: flash attention --------------------

def _flash_attention_kernel(q_ref, k_ref, v_ref, o_ref, m_sc, l_sc, acc_sc):
    # q_ref: (1, tq, D) pre-scaled Q tile; k_ref/v_ref: (1, tkv, D); o_ref: (1, tq, D).
    # m_sc/l_sc: (tq, 128) lane-replicated f32 running max / sum; acc_sc: (tq, D) f32.
    ki = pl.program_id(2)
    nkv = pl.num_programs(2)
    cdt = q_ref.dtype              # MXU operand dtype (bf16 stays bf16, f32 stays f32)

    @pl.when(ki == 0)
    def _init():
        m_sc[...] = jnp.full_like(m_sc, -jnp.inf)
        l_sc[...] = jnp.zeros_like(l_sc)
        acc_sc[...] = jnp.zeros_like(acc_sc)

    q = q_ref[0]                   # (tq, D)
    k = k_ref[0]                   # (tkv, D)
    v = v_ref[0]                   # (tkv, D)

    # Scores: contract the last dims of q and k — no explicit transpose of K.
    s = lax.dot_general(q, k, (((1,), (1,)), ((), ())),
                        preferred_element_type=jnp.float32)          # (tq, tkv) f32

    # Online (flash) softmax; statistics kept lane-replicated in f32.
    m_prev = m_sc[...]                                               # (tq, 128)
    l_prev = l_sc[...]                                               # (tq, 128)
    m_new = jnp.maximum(m_prev, jnp.max(s, axis=-1, keepdims=True))  # (tq, 128)
    alpha = jnp.exp(m_prev - m_new)                                  # (tq, 128)
    p = jnp.exp(s - _bcast_minor(m_new, s.shape[-1]))                # (tq, tkv)
    l_sc[...] = alpha * l_prev + jnp.sum(p, axis=-1, keepdims=True)
    acc_sc[...] = (acc_sc[...] * _bcast_minor(alpha, acc_sc.shape[-1])
                   + jnp.dot(p.astype(cdt), v, preferred_element_type=jnp.float32))
    m_sc[...] = m_new

    @pl.when(ki == nkv - 1)
    def _finalize():
        # Exact reciprocal to hold the 1e-5 tolerance; approx=True (EUP) is a
        # free epilogue win when looser accuracy is acceptable.
        inv_l = pl.reciprocal(l_sc[...], approx=False)
        o_ref[0] = (acc_sc[...] * _bcast_minor(inv_l, acc_sc.shape[-1])
                    ).astype(o_ref.dtype)


def _flash_attention(q, k, v, *, tq, tkv):
    B, S, D = q.shape
    grid = (B, S // tq, S // tkv)
    return pl.pallas_call(
        _flash_attention_kernel,
        out_shape=jax.ShapeDtypeStruct((B, S, D), q.dtype),
        grid_spec=pltpu.PrefetchScalarGridSpec(
            num_scalar_prefetch=0,
            grid=grid,
            in_specs=[
                pl.BlockSpec((1, tq, D), lambda b, qi, ki: (b, qi, 0)),   # Q tile
                pl.BlockSpec((1, tkv, D), lambda b, qi, ki: (b, ki, 0)),  # K tile
                pl.BlockSpec((1, tkv, D), lambda b, qi, ki: (b, ki, 0)),  # V tile
            ],
            out_specs=pl.BlockSpec((1, tq, D), lambda b, qi, ki: (b, qi, 0)),
            scratch_shapes=[
                pltpu.VMEM((tq, _NUM_LANES), jnp.float32),  # running max m (lane-rep)
                pltpu.VMEM((tq, _NUM_LANES), jnp.float32),  # running sum l (lane-rep)
                pltpu.VMEM((tq, D), jnp.float32),           # f32 output accumulator
            ],
        ),
        compiler_params=pltpu.CompilerParams(
            dimension_semantics=("parallel", "parallel", "arbitrary"),
            vmem_limit_bytes=_VMEM_LIMIT,
        ),
    )(q, k, v)


# ----------------------------- public wrapper --------------------------------

def self_attention(x, wq, bq, wk, bk, wv, bv, *, tq=None, tkv=None):
    """x: (B, S, D); weights PyTorch-style (out, in); biases (D,)."""
    B, S, D = x.shape
    scale = float(D) ** -0.5

    # One-time wrapper-side layout prep (XLA, outside the kernels):
    # pre-transpose to (in, out) and fold 1/sqrt(d_k) into Wq/bq in f32.
    wq_t = (jnp.asarray(wq, jnp.float32).T * scale).astype(x.dtype)
    wk_t = jnp.asarray(wk, x.dtype).T
    wv_t = jnp.asarray(wv, x.dtype).T
    bq2 = (jnp.asarray(bq, jnp.float32) * scale).reshape(1, D)
    bk2 = jnp.asarray(bk, jnp.float32).reshape(1, D)
    bv2 = jnp.asarray(bv, jnp.float32).reshape(1, D)

    # Projections computed exactly once per token (kernel 1).
    q2, k2, v2 = _qkv_projection(x.reshape(B * S, D), wq_t, bq2, wk_t, bk2, wv_t, bv2)
    q = q2.reshape(B, S, D)
    k = k2.reshape(B, S, D)
    v = v2.reshape(B, S, D)

    # Tile sizes.  tkv=256 matches the 256-wide MXU on v6e/v7x; pass tkv=128 on
    # v5e.  On v7x pick tq so B * (S // tq) is even (two TensorCores).
    if tq is None:
        tq = S if S <= 128 else _largest_divisor_tile(S, (128, 64, 32, 16, 8))
    if tkv is None:
        tkv = S if S <= 256 else _largest_divisor_tile(S, (256, 128, 64, 32, 16, 8))
    assert S % tq == 0 and S % tkv == 0, "seq_len must be divisible by tile sizes"

    return _flash_attention(q, k, v, tq=tq, tkv=tkv)


def self_attention_ref(x, wq, bq, wk, bk, wv, bv):
    # Pure-JAX reference mirroring the PyTorch forward.
    q = x @ wq.T + bq
    k = x @ wk.T + bk
    v = x @ wv.T + bv
    scores = jnp.einsum("bqd,bkd->bqk", q, k) / jnp.sqrt(jnp.float32(q.shape[-1]))
    w = jax.nn.softmax(scores, axis=-1)
    return jnp.einsum("bqk,bkd->bqd", w, v)


if __name__ == "__main__":
    def make_params(key, d):
        kq, kbq, kk, kbk, kv, kbv = jax.random.split(key, 6)
        bound = 1.0 / float(d) ** 0.5
        wq = jax.random.uniform(kq, (d, d), jnp.float32, -bound, bound)
        bq = jax.random.uniform(kbq, (d,), jnp.float32, -bound, bound)
        wk = jax.random.uniform(kk, (d, d), jnp.float32, -bound, bound)
        bk = jax.random.uniform(kbk, (d,), jnp.float32, -bound, bound)
        wv = jax.random.uniform(kv, (d, d), jnp.float32, -bound, bound)
        bv = jax.random.uniform(kbv, (d,), jnp.float32, -bound, bound)
        return wq, bq, wk, bk, wv, bv

    key = jax.random.PRNGKey(0)
    k_small, k_xs, k_big, k_xb = jax.random.split(key, 4)

    # Small shapes matching the module: batch=2, seq_len=8, input_dim=32.
    B, S, D = 2, 8, 32
    x = jax.random.normal(k_xs, (B, S, D), dtype=jnp.float32)
    params = make_params(k_small, D)
    out = jax.block_until_ready(self_attention(x, *params))
    ref = self_attention_ref(x, *params)
    assert out.shape == (B, S, D)
    assert jnp.allclose(out, ref, atol=1e-5, rtol=1e-5)

    # A second (still small) case that exercises the multi-tile flash path:
    # several q tiles, multiple kv steps (online-softmax accumulation), D=128.
    B2, S2, D2 = 2, 256, 128
    x2 = jax.random.normal(k_xb, (B2, S2, D2), dtype=jnp.float32)
    params2 = make_params(k_big, D2)
    out2 = jax.block_until_ready(self_attention(x2, *params2, tq=128, tkv=128))
    ref2 = self_attention_ref(x2, *params2)
    assert out2.shape == (B2, S2, D2)
    assert jnp.allclose(out2, ref2, atol=1e-4, rtol=1e-4)

    print("KERNEL_OK")
</pallas_src>

<mosaic_0001>
module attributes {stable_mosaic.version = 11 : i64} {
  func.func @_qkv_projection_kernel(%arg0: i32, %arg1: memref<16x32xf32, #tpu.memory_space<vmem>>, %arg2: memref<32x32xf32, #tpu.memory_space<vmem>>, %arg3: memref<1x32xf32, #tpu.memory_space<vmem>>, %arg4: memref<32x32xf32, #tpu.memory_space<vmem>>, %arg5: memref<1x32xf32, #tpu.memory_space<vmem>>, %arg6: memref<32x32xf32, #tpu.memory_space<vmem>>, %arg7: memref<1x32xf32, #tpu.memory_space<vmem>>, %arg8: memref<16x32xf32, #tpu.memory_space<vmem>>, %arg9: memref<16x32xf32, #tpu.memory_space<vmem>>, %arg10: memref<16x32xf32, #tpu.memory_space<vmem>>) attributes {dimension_semantics = [#tpu.dimension_semantics<parallel>], iteration_bounds = array<i64: 1>, scalar_prefetch = 0 : i64, scratch_operands = 0 : i64, tpu.core_type = #tpu.core_type<tc>, window_params = [{transform_indices = @transform_0, window_bounds = array<i64: 16, 32>}, {pipeline_mode = #tpu.pipeline_mode<synchronous>, transform_indices = @transform_1, window_bounds = array<i64: 32, 32>}, {pipeline_mode = #tpu.pipeline_mode<synchronous>, transform_indices = @transform_2, window_bounds = array<i64: 1, 32>}, {pipeline_mode = #tpu.pipeline_mode<synchronous>, transform_indices = @transform_3, window_bounds = array<i64: 32, 32>}, {pipeline_mode = #tpu.pipeline_mode<synchronous>, transform_indices = @transform_4, window_bounds = array<i64: 1, 32>}, {pipeline_mode = #tpu.pipeline_mode<synchronous>, transform_indices = @transform_5, window_bounds = array<i64: 32, 32>}, {pipeline_mode = #tpu.pipeline_mode<synchronous>, transform_indices = @transform_6, window_bounds = array<i64: 1, 32>}, {transform_indices = @transform_7, window_bounds = array<i64: 16, 32>}, {transform_indices = @transform_8, window_bounds = array<i64: 16, 32>}, {transform_indices = @transform_9, window_bounds = array<i64: 16, 32>}]} {
    %c0 = arith.constant 0 : index
    %c0_0 = arith.constant 0 : index
    %0 = vector.load %arg1[%c0, %c0_0] : memref<16x32xf32, #tpu.memory_space<vmem>>, vector<16x32xf32>
    %c0_1 = arith.constant 0 : index
    %c0_2 = arith.constant 0 : index
    %1 = vector.load %arg2[%c0_1, %c0_2] : memref<32x32xf32, #tpu.memory_space<vmem>>, vector<32x32xf32>
    %cst = arith.constant dense<0.000000e+00> : vector<16x32xf32>
    %2 = tpu.matmul %0, %1, %cst {dimension_numbers = #tpu.dot_dimension_numbers<[1], [0], [0], [1], [0, 0, 1, 1], [], []>} : vector<16x32xf32>, vector<32x32xf32>, vector<16x32xf32> -> vector<16x32xf32>
    %c0_3 = arith.constant 0 : index
    %c0_4 = arith.constant 0 : index
    %3 = vector.load %arg3[%c0_3, %c0_4] : memref<1x32xf32, #tpu.memory_space<vmem>>, vector<1x32xf32>
    %4 = vector.broadcast %3 : vector<1x32xf32> to vector<16x32xf32>
    %5 = arith.addf %2, %4 : vector<16x32xf32>
    %c0_5 = arith.constant 0 : index
    %c0_6 = arith.constant 0 : index
    %6 = vector.load %arg8[%c0_5, %c0_6] : memref<16x32xf32, #tpu.memory_space<vmem>>, vector<16x32xf32>
    tpu.vector_store %arg8[%c0_5, %c0_6], %5 {strides = array<i32>} : memref<16x32xf32, #tpu.memory_space<vmem>>, vector<16x32xf32>,
    %c0_7 = arith.constant 0 : index
    %c0_8 = arith.constant 0 : index
    %7 = vector.load %arg4[%c0_7, %c0_8] : memref<32x32xf32, #tpu.memory_space<vmem>>, vector<32x32xf32>
    %cst_9 = arith.constant dense<0.000000e+00> : vector<16x32xf32>
    %8 = tpu.matmul %0, %7, %cst_9 {dimension_numbers = #tpu.dot_dimension_numbers<[1], [0], [0], [1], [0, 0, 1, 1], [], []>} : vector<16x32xf32>, vector<32x32xf32>, vector<16x32xf32> -> vector<16x32xf32>
    %c0_10 = arith.constant 0 : index
    %c0_11 = arith.constant 0 : index
    %9 = vector.load %arg5[%c0_10, %c0_11] : memref<1x32xf32, #tpu.memory_space<vmem>>, vector<1x32xf32>
    %10 = vector.broadcast %9 : vector<1x32xf32> to vector<16x32xf32>
    %11 = arith.addf %8, %10 : vector<16x32xf32>
    %c0_12 = arith.constant 0 : index
    %c0_13 = arith.constant 0 : index
    %12 = vector.load %arg9[%c0_12, %c0_13] : memref<16x32xf32, #tpu.memory_space<vmem>>, vector<16x32xf32>
    tpu.vector_store %arg9[%c0_12, %c0_13], %11 {strides = array<i32>} : memref<16x32xf32, #tpu.memory_space<vmem>>, vector<16x32xf32>,
    %c0_14 = arith.constant 0 : index
    %c0_15 = arith.constant 0 : index
    %13 = vector.load %arg6[%c0_14, %c0_15] : memref<32x32xf32, #tpu.memory_space<vmem>>, vector<32x32xf32>
    %cst_16 = arith.constant dense<0.000000e+00> : vector<16x32xf32>
    %14 = tpu.matmul %0, %13, %cst_16 {dimension_numbers = #tpu.dot_dimension_numbers<[1], [0], [0], [1], [0, 0, 1, 1], [], []>} : vector<16x32xf32>, vector<32x32xf32>, vector<16x32xf32> -> vector<16x32xf32>
    %c0_17 = arith.constant 0 : index
    %c0_18 = arith.constant 0 : index
    %15 = vector.load %arg7[%c0_17, %c0_18] : memref<1x32xf32, #tpu.memory_space<vmem>>, vector<1x32xf32>
    %16 = vector.broadcast %15 : vector<1x32xf32> to vector<16x32xf32>
    %17 = arith.addf %14, %16 : vector<16x32xf32>
    %c0_19 = arith.constant 0 : index
    %c0_20 = arith.constant 0 : index
    %18 = vector.load %arg10[%c0_19, %c0_20] : memref<16x32xf32, #tpu.memory_space<vmem>>, vector<16x32xf32>
    tpu.vector_store %arg10[%c0_19, %c0_20], %17 {strides = array<i32>} : memref<16x32xf32, #tpu.memory_space<vmem>>, vector<16x32xf32>,
    return
  }
  func.func @transform_0(%arg0: i32) -> (i32, i32) {
    %c0_i32 = arith.constant 0 : i32
    %c0_i32_0 = arith.constant 0 : i32
    return %arg0, %c0_i32 : i32, i32
  }
  func.func @transform_1(%arg0: i32) -> (i32, i32) {
    %c0_i32 = arith.constant 0 : i32
    %c0_i32_0 = arith.constant 0 : i32
    %c0_i32_1 = arith.constant 0 : i32
    return %c0_i32, %c0_i32_0 : i32, i32
  }
  func.func @transform_2(%arg0: i32) -> (i32, i32) {
    %c0_i32 = arith.constant 0 : i32
    %c0_i32_0 = arith.constant 0 : i32
    %c0_i32_1 = arith.constant 0 : i32
    return %c0_i32, %c0_i32_0 : i32, i32
  }
  func.func @transform_3(%arg0: i32) -> (i32, i32) {
    %c0_i32 = arith.constant 0 : i32
    %c0_i32_0 = arith.constant 0 : i32
    %c0_i32_1 = arith.constant 0 : i32
    return %c0_i32, %c0_i32_0 : i32, i32
  }
  func.func @transform_4(%arg0: i32) -> (i32, i32) {
    %c0_i32 = arith.constant 0 : i32
    %c0_i32_0 = arith.constant 0 : i32
    %c0_i32_1 = arith.constant 0 : i32
    return %c0_i32, %c0_i32_0 : i32, i32
  }
  func.func @transform_5(%arg0: i32) -> (i32, i32) {
    %c0_i32 = arith.constant 0 : i32
    %c0_i32_0 = arith.constant 0 : i32
    %c0_i32_1 = arith.constant 0 : i32
    return %c0_i32, %c0_i32_0 : i32, i32
  }
  func.func @transform_6(%arg0: i32) -> (i32, i32) {
    %c0_i32 = arith.constant 0 : i32
    %c0_i32_0 = arith.constant 0 : i32
    %c0_i32_1 = arith.constant 0 : i32
    return %c0_i32, %c0_i32_0 : i32, i32
  }
  func.func @transform_7(%arg0: i32) -> (i32, i32) {
    %c0_i32 = arith.constant 0 : i32
    %c0_i32_0 = arith.constant 0 : i32
    return %arg0, %c0_i32 : i32, i32
  }
  func.func @transform_8(%arg0: i32) -> (i32, i32) {
    %c0_i32 = arith.constant 0 : i32
    %c0_i32_0 = arith.constant 0 : i32
    return %arg0, %c0_i32 : i32, i32
  }
  func.func @transform_9(%arg0: i32) -> (i32, i32) {
    %c0_i32 = arith.constant 0 : i32
    %c0_i32_0 = arith.constant 0 : i32
    return %arg0, %c0_i32 : i32, i32
  }
}

</mosaic_0001>

<bundles_post_ra>
// kernel: tpu_custom_call.1
= control target key start
LH: loop header
LB: loop body
LE: loop exit
PB: predicated region body
PF: predicated region fallthrough
CT: control target
= control target key end

     0   :  { %15 = vsyncpa [#allocation3], 0  ;;  %s580_s0 = inlined_call_operand.hbm [shape: f32[16,32], index: 0, kind: input, shape index: {}]   ;;  %s581_s1 = inlined_call_operand.hbm [shape: f32[32,32], index: 1, kind: input, shape index: {}]   ;;  %s582_s2 = inlined_call_operand.vmem [shape: f32[1,32], index: 2, kind: input, shape index: {}]   ;;  %s583_s3 = inlined_call_operand.hbm [shape: f32[32,32], index: 3, kind: input, shape index: {}]   ;;  %s584_s4 = inlined_call_operand.vmem [shape: f32[1,32], index: 4, kind: input, shape index: {}]   ;;  %s585_s5 = inlined_call_operand.hbm [shape: f32[32,32], index: 5, kind: input, shape index: {}]   ;;  %s586_s6 = inlined_call_operand.vmem [shape: f32[1,32], index: 6, kind: input, shape index: {}]   ;;  %s587_s7 = inlined_call_operand.hbm [shape: f32[16,32], index: 7, kind: output, shape index: {0}]   ;;  %s588_s8 = inlined_call_operand.hbm [shape: f32[16,32], index: 8, kind: output, shape index: {1}]   ;;  %s589_s9 = inlined_call_operand.hbm [shape: f32[16,32], index: 9, kind: output, shape index: {2}]  }
   0x1   :  { %16 = vsyncpa [#allocation6], 0 }
   0x2   :  { %17 = vsyncpa [#allocation9], 0 }
   0x3   :  { %18 = vsyncpa [#allocation4], 0 }
   0x4   :  { %19 = vsyncpa [#allocation12], 0  ;;  %s37_s11 = sshll.u32 %s581_s1, 4  ;;  %s458_s12 = smov [#allocation5]   ;;  %s38_s11 = int_to_ptr.hbm [resolvable:$true] %s37_s11 }
   0x5   :  { %s39_s13 = sshll.u32 %s458_s12, 4  ;;  %s24_s16 = sshll.u32 %s580_s0, 4  ;;  %s40_s13 = int_to_ptr.vmem [resolvable:$true] %s39_s13  ;;  %s25_s16 = int_to_ptr.hbm [resolvable:$true] %s24_s16 }
   0x6   :  { %s459_s17 = smov 128   ;;  %s460_s18 = smov 8  }
   0x7   :  { %45 = dma.hbm_to_vmem [thread:$0]  %s38_s11, 512, %s40_s13, [#allocation6], %s459_s17, %s459_s17, %s460_s18  }
   0x8   :  { %s461_s19 = smov [#allocation2]   ;;  %s52_s1 = sshll.u32 %s583_s3, 4  ;;  %s53_s1 = int_to_ptr.hbm [resolvable:$true] %s52_s1 }
   0x9   :  { %s26_s20 = sshll.u32 %s461_s19, 4  ;;  %s67_s24 = sshll.u32 %s585_s5, 4  ;;  %s27_s20 = int_to_ptr.vmem [resolvable:$true] %s26_s20  ;;  %s68_s24 = int_to_ptr.hbm [resolvable:$true] %s67_s24 }
   0xa   :  { %32 = dma.hbm_to_vmem [thread:$0]  %s25_s16, 256, %s27_s20, [#allocation3], %s459_s17, %s459_s17, %s460_s18  }
   0xb   :  { %s462_s25 = smov [#allocation7]   ;;  %s463_s27 = smov [#allocation8]  }
   0xc   :  { %s54_s26 = sshll.u32 %s462_s25, 4  ;;  %s69_s3 = sshll.u32 %s463_s27, 4  ;;  %s55_s26 = int_to_ptr.vmem [resolvable:$true] %s54_s26  ;;  %s70_s3 = int_to_ptr.vmem [resolvable:$true] %s69_s3 }
   0xd   :  { %60 = dma.hbm_to_vmem [thread:$0]  %s53_s1, 512, %s55_s26, [#allocation6], %s459_s17, %s459_s17, %s460_s18  }
   0xe   :  { %75 = dma.hbm_to_vmem [thread:$0]  %s68_s24, 512, %s70_s3, [#allocation9], %s459_s17, %s459_s17, %s460_s18  }
   0xf   :  { %448 = dma.done.wait [#allocation3], 256  }
  0x10   :  { %449 = vsyncadd [#allocation3], 4294967040 }
  0x11   :  { %450 = dma.done.wait [#allocation6], 1024  }
  0x12   :  { %451 = vsyncadd [#allocation6], 4294966272 }
  0x13   :  { %452 = dma.done.wait [#allocation9], 512  }
  0x14   :  { %453 = vsyncadd [#allocation9], 4294966784  ;;  %v172_v0 = vld [vmem:[#allocation8 + $0x18] sm:$0xff]  ;;  %v171_v1 = vld [vmem:[#allocation8 + $0x10] sm:$0xff]  ;;  %vm104_vm0 = vcmask 261120   ;;  %s464_s12 = smov [#allocation10]  }
  0x15   :  { %189 = vmatpush.msra.mxu2 %v172_v0  ;;  %v139_v2 = vld [vmem:[#allocation7 + $0x18] sm:$0xff]  ;;  %v138_v3 = vld [vmem:[#allocation7 + $0x10] sm:$0xff]  ;;  %v170_v4 = vld [vmem:[#allocation8 + $0x8] sm:$0xff]  ;;  %s206_s13 = sshll.u32 %s464_s12, 4  ;;  %s465_s16 = smov [#allocation11]   ;;  %s207_s13 = int_to_ptr.vmem [resolvable:$true] %s206_s13 }
  0x16   :  { %156 = vmatpush.msra.mxu1 %v139_v2  ;;  %v99_v5 = vld [vmem:[#allocation5 + $0x18] sm:$0xff]  ;;  %v169_v6 = vld [vmem:[#allocation8] sm:$0xff]  ;;  %v137_v7 = vld [vmem:[#allocation7 + $0x8] sm:$0xff]  ;;  %s219_s19 = sshll.u32 %s465_s16, 4  ;;  %s221_s21 = sshll.u32 %s588_s8, 4  ;;  %s220_s19 = int_to_ptr.vmem [resolvable:$true] %s219_s19  ;;  %s222_s21 = int_to_ptr.hbm [resolvable:$true] %s221_s21 }
  0x17   :  { %190 = vmatpush.msra.mxu2 %v171_v1  ;;  %264 = vmatpush.msra.mxu3 %v99_v5  ;;  %v98_v8 = vld [vmem:[#allocation5 + $0x10] sm:$0xff]  ;;  %v97_v10 = vld [vmem:[#allocation5 + $0x8] sm:$0xff]  ;;  %v136_v11 = vld [vmem:[#allocation7] sm:$0xff]  ;;  %s234_s8 = sshll.u32 %s589_s9, 4  ;;  %s235_s8 = int_to_ptr.hbm [resolvable:$true] %s234_s8 }
  0x18   :  { %157 = vmatpush.msra.mxu1 %v138_v3  ;;  %v94_v9 = vld [vmem:[#allocation2] sm:$0xff]  ;;  %123 = vmatpush.msra.mxu0 %v99_v5  ;;  %v96_v12 = vld [vmem:[#allocation5] sm:$0xff]  ;;  %v95_v13 = vld [vmem:[#allocation2 + $0x8] sm:$0xff] }
  0x19   :  { %191 = vmatpush.msra.mxu2 %v170_v4  ;;  %265 = vmatpush.msra.mxu3 %v98_v8  ;;  %v277_v14 = vld [vmem:[%s584_s4] ss:$0 sm:$0xff]  ;;  %s208_s4 = sshll.u32 %s587_s7, 4  ;;  %s209_s4 = int_to_ptr.hbm [resolvable:$true] %s208_s4 }
  0x1a   :  { %158 = vmatpush.msra.mxu1 %v137_v7  ;;  %124 = vmatpush.msra.mxu0 %v98_v8  ;;  %v279_v17 = vld [vmem:[%s582_s2] ss:$0 sm:$0xff] }
  0x1b   :  { %192 = vmatpush.msra.mxu2 %v169_v6  ;;  %266 = vmatpush.msra.mxu3 %v97_v10  ;;  %v278_v18 = vld [vmem:[%s586_s6] ss:$0 sm:$0xff]  ;;  %s466_s6 = smov [#allocation13]  }
  0x1c   :  { %262 = vmatmul.msk.f32.vlgmr.msra.gmra.mxu2 %vm104_vm0, %v94_v9  ;;  %159 = vmatpush.msra.mxu1 %v136_v11  ;;  %s232_s7 = sshll.u32 %s466_s6, 4  ;;  %s233_s7 = int_to_ptr.vmem [resolvable:$true] %s232_s7 }
  0x1d   :  { %260 = vmatmul.msk.f32.vlgmr.msra.gmra.mxu1 %vm104_vm0, %v94_v9  ;;  %267 = vmatpush.msra.mxu3 %v96_v12 }
  0x1e   :  { %259 = vmatmul.msk.f32.vlgmr.msra.gmra.mxu3 %vm104_vm0, %v95_v13  ;;  %125 = vmatpush.msra.mxu0 %v97_v10 }
  0x20   :  { %126 = vmatpush.msra.mxu0 %v96_v12 }
  0x21   :  { %258 = vmatmul.msk.f32.vlgmr.msra.gmra.mxu0 %vm104_vm0, %v94_v9 }
  0x24   :  { %263 = vmatmul.msk.f32.gmra.mxu2 %vm104_vm0, %v95_v13 }
  0x25   :  { %261 = vmatmul.msk.f32.gmra.mxu1 %vm104_vm0, %v95_v13 }
  0x9a   :  { %v161_v15 = vpop.f32.mrf.mxu1 }
  0x9b   :  { %v162_v16 = vadd.f32 %v277_v14, %v161_v15 }
  0x9d   :  { %167 = vst.msk [vmem:[#allocation11] sm:$0xff] %vm104_vm0, %v162_v16 }
  0x9e   :  { %v128_v19 = vpop.f32.mrf.mxu0 }
  0x9f   :  { %v194_v20 = vpop.f32.mrf.mxu2  ;;  %v129_v21 = vadd.f32 %v279_v17, %v128_v19 }
  0xa0   :  { %v195_v22 = vadd.f32 %v278_v18, %v194_v20 }
  0xa1   :  { %134 = vst.msk [vmem:[#allocation10] sm:$0xff] %vm104_vm0, %v129_v21  ;;  %v131_v23 = vpop.f32.mrf.mxu3 }
  0xa2   :  { %200 = vst.msk [vmem:[#allocation13] sm:$0xff] %vm104_vm0, %v195_v22  ;;  %v164_v24 = vpop.f32.mrf.mxu1  ;;  %v132_v25 = vadd.f32 %v279_v17, %v131_v23 }
  0xa3   :  { %v165_v26 = vadd.f32 %v277_v14, %v164_v24 }
  0xa4   :  { %135 = vst.msk [vmem:[#allocation10 + $0x8] sm:$0xff] %vm104_vm0, %v132_v25 }
  0xa5   :  { %168 = vst.msk [vmem:[#allocation11 + $0x8] sm:$0xff] %vm104_vm0, %v165_v26  ;;  %214 = dma.vmem_to_hbm [thread:$0]  %s207_s13, 256, %s209_s4, [#allocation4], %s459_s17, %s459_s17, %s460_s18  }
  0xa6   :  { %227 = dma.vmem_to_hbm [thread:$0]  %s220_s19, 256, %s222_s21, [#allocation12], %s459_s17, %s459_s17, %s460_s18  }
  0xa7   :  { %v197_v27 = vpop.f32.mrf.mxu2 }
  0xa8   :  { %v198_v28 = vadd.f32 %v278_v18, %v197_v27 }
  0xaa   :  { %201 = vst.msk [vmem:[#allocation13 + $0x8] sm:$0xff] %vm104_vm0, %v198_v28 }
  0xab   :  { %240 = dma.vmem_to_hbm [thread:$0]  %s233_s7, 256, %s235_s8, [#allocation12], %s459_s17, %s459_s17, %s460_s18  }
  0xac   :  { %454 = dma.done.wait [#allocation4], 256  }
  0xad   :  { %455 = vsyncadd [#allocation4], 4294967040 }
  0xae   :  { %456 = dma.done.wait [#allocation12], 512  }
  0xaf   :  { %457 = vsyncadd [#allocation12], 4294966784 }
  0xb0   :  { %253 = vsyncpa [#allocation3], 1 }
  0xb1   :  { %254 = vsyncpa [#allocation6], 1 }
  0xb2   :  { %255 = vsyncpa [#allocation9], 1 }
  0xb3   :  { %256 = vsyncpa [#allocation4], 1 }
  0xb4   :  { %257 = vsyncpa [#allocation12], 1 }

</bundles_post_ra>
